<compile_context>
chip_gen: v5e
topology: v5e:2x2
jax: 0.10.0
libtpu: 0.0.40
codegen_flags: <defaults>
</compile_context>

<pallas_src>
import numpy as np
import jax
import jax.numpy as jnp
from jax import lax
from jax.experimental import pallas as pl
from jax.experimental.pallas import tpu as pltpu

P_FACTOR = 3  # args.p_factor; the s*s*s shortcut is only valid for integer p == 3
assert P_FACTOR == 3, "s*s*s activation shortcut requires p_factor == 3"


def _round_up(x, m):
    return (x + m - 1) // m * m


# --------------------------------------------------------------------------
# Stage 1: exemplar-side precompute (independent of the batch).
#   knT = F.normalize(ex_features @ wk + bk, dim=1).T   stored (feat_dim, N_pad), bf16
#   ecr = ex_classes @ class_reps                        (train_ex_class=False branch)
# Zero-padded exemplar rows give exactly-zero ecr rows, so padded N columns
# contribute nothing to echo/logits.
# --------------------------------------------------------------------------
def _exemplar_precompute_kernel(exfeat_ref, wk_ref, bkT_ref, exclass_ref,
                                classrep_ref, knT_ref, ecr_ref):
    # kT = (ex_features @ wk)^T + bk^T, computed directly in (feat_dim, TN) layout
    # so the store is lane-dense (TN on the 128-lane axis).
    kT = lax.dot_general(wk_ref[...], exfeat_ref[...],
                         dimension_numbers=(((0,), (1,)), ((), ())),
                         preferred_element_type=jnp.float32) + bkT_ref[...]
    # F.normalize(x, dim=1) with eps clamping; rsqrt goes to the EUP.
    inv_norm = lax.rsqrt(jnp.maximum(jnp.sum(kT * kT, axis=0, keepdims=True), 1e-24))
    knT_ref[...] = (kT * inv_norm).astype(knT_ref.dtype)
    ecr_ref[...] = jnp.dot(exclass_ref[...], classrep_ref[...],
                           preferred_element_type=jnp.float32)


# --------------------------------------------------------------------------
# Stage 2: tiled minerva forward over grid (B tiles, N tiles).
#   grid axis 0 (B): parallel (megacore shard on v7x)
#   grid axis 1 (N): arbitrary (sequential reduction into the resident echo block)
# --------------------------------------------------------------------------
def _minerva_main_kernel(feat_ref, wq_ref, bq_ref, knT_ref, ecr_ref,
                         classrepT_ref, mult_ref, thresh_ref,
                         act_ref, echo_ref, logits_ref,
                         qn_scratch):
    n = pl.program_id(1)

    @pl.when(n == 0)
    def _():
        # g_q projection + normalization, once per B tile (cached across N tiles).
        # TODO(synk): nn.Dropout(train mode) not implemented; eval-mode identity used.
        q = jnp.dot(feat_ref[...], wq_ref[...],
                    preferred_element_type=jnp.float32) + bq_ref[...]
        inv_norm = lax.rsqrt(jnp.maximum(jnp.sum(q * q, axis=-1, keepdims=True), 1e-24))
        qn_scratch[...] = (q * inv_norm).astype(qn_scratch.dtype)
        echo_ref[...] = jnp.zeros_like(echo_ref)

    # s = qn @ kn.T as a plain (TB, K) @ (K, TN) matmul on bf16 inputs, f32 accum.
    s = jnp.dot(qn_scratch[...], knT_ref[...], preferred_element_type=jnp.float32)
    # activation: |s|^3 * sign(s) == s^3  (two VPU multiplies, no EUP pow)
    a = s * s * s
    act_ref[...] = a.astype(act_ref.dtype)

    # partial echo contribution for this N tile, accumulated in the resident
    # output block (constant block index across n).
    echo_ref[...] += jnp.dot(a, ecr_ref[...], preferred_element_type=jnp.float32)

    @pl.when(n == pl.num_programs(1) - 1)
    def _():
        # logits = echo @ class_reps.T  (class_reps pre-transposed in the wrapper)
        logits = jnp.dot(echo_ref[...], classrepT_ref[...],
                         preferred_element_type=jnp.float32)
        logits_ref[...] = logits * mult_ref[...] - thresh_ref[...]


# --------------------------------------------------------------------------
# Wrapper
# --------------------------------------------------------------------------
def minerva_ffnn4_forward(features, ex_features, params, *, tb=512, tn=4096,
                          matmul_dtype=jnp.bfloat16, act_dtype=jnp.float32):
    """Forward pass of minerva_ffnn4 (labels=None path).

    Default tiles (TB=512, TN=4096 -> 8 MiB f32 act tile, ~22 MiB total VMEM with
    double buffering) target v6e/v7x; pass tb=256, tn=2048 on v5e.
    matmul_dtype=bf16 feeds the score matmul with MXU-native inputs (f32 accum);
    pass jnp.float32 for bit-closer numerics.
    """
    B, input_dim = features.shape
    N, _ = ex_features.shape
    feat_dim = params["wq"].shape[1]
    num_classes, class_dim = params["class_reps"].shape

    TB = int(min(tb, _round_up(B, 8)))
    # v7x megacore: make sure the "parallel" B axis has at least 2 tiles when the
    # batch is large enough to split (single-TC v5e/v6e: no-op).
    if B > 8 and pl.cdiv(B, TB) < 2:
        TB = int(_round_up(pl.cdiv(B, 2), 8))
    TN = int(min(tn, _round_up(N, 128)))
    N_pad = _round_up(N, TN)

    f32 = jnp.float32
    # Zero-pad the exemplar side only (semantically required: padded ex_classes
    # rows -> zero ecr rows -> zero echo contribution from padded N columns).
    exfeat_p = jnp.pad(ex_features.astype(f32), ((0, N_pad - N), (0, 0)))
    exclass_p = jnp.pad(params["ex_classes"].astype(f32), ((0, N_pad - N), (0, 0)))

    bk_t = params["bk"].astype(f32).reshape(feat_dim, 1)        # (feat_dim, 1)
    class_reps = params["class_reps"].astype(f32)                # (num_classes, class_dim)
    class_reps_t = class_reps.T                                  # (class_dim, num_classes)

    # ~22 MiB actually used at TB=512/TN=4096; 56 MiB cap fits v7x's 64 MiB
    # physical VMEM and is well above v5e/v6e scoped defaults.
    vmem_limit = 56 * 1024 * 1024

    # ---- stage 1: exemplar precompute (hoisted out of the B loop) ----
    knT, ecr = pl.pallas_call(
        _exemplar_precompute_kernel,
        out_shape=(jax.ShapeDtypeStruct((feat_dim, N_pad), matmul_dtype),
                   jax.ShapeDtypeStruct((N_pad, class_dim), f32)),
        grid_spec=pltpu.PrefetchScalarGridSpec(
            num_scalar_prefetch=0,
            grid=(N_pad // TN,),
            in_specs=[pl.BlockSpec((TN, input_dim), lambda n: (n, 0)),
                      pl.BlockSpec((input_dim, feat_dim), lambda n: (0, 0)),
                      pl.BlockSpec((feat_dim, 1), lambda n: (0, 0)),
                      pl.BlockSpec((TN, num_classes), lambda n: (n, 0)),
                      pl.BlockSpec((num_classes, class_dim), lambda n: (0, 0))],
            out_specs=(pl.BlockSpec((feat_dim, TN), lambda n: (0, n)),
                       pl.BlockSpec((TN, class_dim), lambda n: (n, 0)))),
        compiler_params=pltpu.CompilerParams(
            dimension_semantics=("parallel",),
            vmem_limit_bytes=vmem_limit),
    )(exfeat_p, params["wk"].astype(f32), bk_t, exclass_p, class_reps)

    # ---- stage 2: tiled minerva forward (unpadded outputs; Pallas clips boundary tiles) ----
    grid = (pl.cdiv(B, TB), N_pad // TN)
    act, echo, logits = pl.pallas_call(
        _minerva_main_kernel,
        out_shape=(jax.ShapeDtypeStruct((B, N), act_dtype),          # activations
                   jax.ShapeDtypeStruct((B, class_dim), f32),        # echo
                   jax.ShapeDtypeStruct((B, num_classes), f32)),     # logits
        grid_spec=pltpu.PrefetchScalarGridSpec(
            num_scalar_prefetch=0,
            grid=grid,
            in_specs=[pl.BlockSpec((TB, input_dim), lambda b, n: (b, 0)),
                      pl.BlockSpec((input_dim, feat_dim), lambda b, n: (0, 0)),
                      pl.BlockSpec((1, feat_dim), lambda b, n: (0, 0)),
                      pl.BlockSpec((feat_dim, TN), lambda b, n: (0, n)),
                      # NOTE: (TN, class_dim) ecr tile lane-pads class_dim -> 128 in
                      # VMEM; kept as-is since (TB,TN)@(TN,class_dim) is the natural
                      # MXU layout for the echo contraction.
                      pl.BlockSpec((TN, class_dim), lambda b, n: (n, 0)),
                      pl.BlockSpec((class_dim, num_classes), lambda b, n: (0, 0)),
                      pl.BlockSpec((1, num_classes), lambda b, n: (0, 0)),
                      pl.BlockSpec((1, num_classes), lambda b, n: (0, 0))],
            out_specs=(pl.BlockSpec((TB, TN), lambda b, n: (b, n)),
                       pl.BlockSpec((TB, class_dim), lambda b, n: (b, 0)),
                       pl.BlockSpec((TB, num_classes), lambda b, n: (b, 0))),
            scratch_shapes=[pltpu.VMEM((TB, feat_dim), matmul_dtype)]),  # cached qn
        compiler_params=pltpu.CompilerParams(
            dimension_semantics=("parallel", "arbitrary"),
            vmem_limit_bytes=vmem_limit),
    )(features.astype(f32), params["wq"].astype(f32), params["bq"].astype(f32),
      knT, ecr, class_reps_t, params["mult"].astype(f32), params["thresh"].astype(f32))

    # TODO(synk): BCEWithLogitsLoss branch omitted (labels=None path of the module).
    return {
        "echo": echo,
        "loss": None,
        "logits": logits,
        "activations": act,
    }


def reference_forward(features, ex_features, params):
    """Plain-JAX reference mirroring the PyTorch forward (for sanity check)."""
    q = features @ params["wq"] + params["bq"]
    k = ex_features @ params["wk"] + params["bk"]
    qn = q / jnp.maximum(jnp.linalg.norm(q, axis=-1, keepdims=True), 1e-12)
    kn = k / jnp.maximum(jnp.linalg.norm(k, axis=-1, keepdims=True), 1e-12)
    s = qn @ kn.T
    a = jnp.power(jnp.abs(s), float(P_FACTOR)) * jnp.sign(s)
    ex_class_reps = params["ex_classes"] @ params["class_reps"]
    echo = a @ ex_class_reps
    logits = (echo @ params["class_reps"].T) * params["mult"] - params["thresh"]
    return echo, logits, a


if __name__ == "__main__":
    # Small shapes consistent with the module's forward.
    B, input_dim, feat_dim = 8, 32, 16       # batch, args.input_dim, args.feat_dim
    N, num_classes, class_dim = 64, 4, 8     # exemplars, args.num_classes, args.class_dim

    key = jax.random.PRNGKey(0)
    keys = jax.random.split(key, 8)

    features = jax.random.normal(keys[0], (B, input_dim), dtype=jnp.float32)
    ex_features = jax.random.normal(keys[1], (N, input_dim), dtype=jnp.float32)

    params = {
        # g_q / g_k Linear layers (weights stored as (in, out))
        "wq": jax.random.normal(keys[2], (input_dim, feat_dim), jnp.float32) * (1.0 / np.sqrt(input_dim)),
        "bq": jax.random.normal(keys[3], (1, feat_dim), jnp.float32) * 0.01,
        "wk": jax.random.normal(keys[4], (input_dim, feat_dim), jnp.float32) * (1.0 / np.sqrt(input_dim)),
        "bk": jax.random.normal(keys[5], (1, feat_dim), jnp.float32) * 0.01,
        # exemplar class matrix (N, num_classes) and class_reps = torch.rand(num_classes, class_dim)
        "ex_classes": jax.random.uniform(keys[6], (N, num_classes), jnp.float32),
        "class_reps": jax.random.uniform(keys[7], (num_classes, class_dim), jnp.float32),
        # args.use_mult / args.use_thresh parameters (module inits: ones / zeros)
        "mult": jnp.ones((1, num_classes), jnp.float32),
        "thresh": jnp.zeros((1, num_classes), jnp.float32),
    }

    ref_echo, ref_logits, ref_a = reference_forward(features, ex_features, params)

    # f32 matmul path: tight check of the kernel structure against the reference.
    out_f32 = minerva_ffnn4_forward(features, ex_features, params,
                                    matmul_dtype=jnp.float32)
    jax.block_until_ready((out_f32["echo"], out_f32["logits"], out_f32["activations"]))
    np.testing.assert_allclose(np.asarray(out_f32["echo"]), np.asarray(ref_echo), rtol=1e-4, atol=1e-4)
    np.testing.assert_allclose(np.asarray(out_f32["logits"]), np.asarray(ref_logits), rtol=1e-4, atol=1e-4)
    np.testing.assert_allclose(np.asarray(out_f32["activations"]), np.asarray(ref_a), rtol=1e-4, atol=1e-4)

    # Default perf config (bf16 score-matmul inputs, f32 accumulation): unit-normalized
    # qn/kn make bf16 inputs benign, but the cubing amplifies rounding -> looser tolerance.
    out = minerva_ffnn4_forward(features, ex_features, params)
    jax.block_until_ready((out["echo"], out["logits"], out["activations"]))
    np.testing.assert_allclose(np.asarray(out["echo"]), np.asarray(ref_echo), rtol=3e-2, atol=3e-2)
    np.testing.assert_allclose(np.asarray(out["logits"]), np.asarray(ref_logits), rtol=3e-2, atol=3e-2)
    np.testing.assert_allclose(np.asarray(out["activations"]), np.asarray(ref_a), rtol=3e-2, atol=3e-2)

    print("KERNEL_OK")
</pallas_src>

<mosaic_0001>
module attributes {stable_mosaic.version = 11 : i64} {
  func.func @_exemplar_precompute_kernel(%arg0: i32, %arg1: memref<128x32xf32, #tpu.memory_space<vmem>>, %arg2: memref<32x16xf32, #tpu.memory_space<vmem>>, %arg3: memref<16x1xf32, #tpu.memory_space<vmem>>, %arg4: memref<128x4xf32, #tpu.memory_space<vmem>>, %arg5: memref<4x8xf32, #tpu.memory_space<vmem>>, %arg6: memref<16x128xf32, #tpu.memory_space<vmem>>, %arg7: memref<128x8xf32, #tpu.memory_space<vmem>>) attributes {dimension_semantics = [#tpu.dimension_semantics<parallel>], iteration_bounds = array<i64: 1>, scalar_prefetch = 0 : i64, scratch_operands = 0 : i64, tpu.core_type = #tpu.core_type<tc>, window_params = [{transform_indices = @transform_0, window_bounds = array<i64: 128, 32>}, {pipeline_mode = #tpu.pipeline_mode<synchronous>, transform_indices = @transform_1, window_bounds = array<i64: 32, 16>}, {pipeline_mode = #tpu.pipeline_mode<synchronous>, transform_indices = @transform_2, window_bounds = array<i64: 16, 1>}, {transform_indices = @transform_3, window_bounds = array<i64: 128, 4>}, {pipeline_mode = #tpu.pipeline_mode<synchronous>, transform_indices = @transform_4, window_bounds = array<i64: 4, 8>}, {transform_indices = @transform_5, window_bounds = array<i64: 16, 128>}, {transform_indices = @transform_6, window_bounds = array<i64: 128, 8>}]} {
    %c0 = arith.constant 0 : index
    %c0_0 = arith.constant 0 : index
    %0 = vector.load %arg2[%c0, %c0_0] : memref<32x16xf32, #tpu.memory_space<vmem>>, vector<32x16xf32>
    %c0_1 = arith.constant 0 : index
    %c0_2 = arith.constant 0 : index
    %1 = vector.load %arg1[%c0_1, %c0_2] : memref<128x32xf32, #tpu.memory_space<vmem>>, vector<128x32xf32>
    %cst = arith.constant dense<0.000000e+00> : vector<16x128xf32>
    %2 = tpu.matmul %0, %1, %cst {dimension_numbers = #tpu.dot_dimension_numbers<[0], [1], [1], [0], [0, 1, 1, 0], [], []>} : vector<32x16xf32>, vector<128x32xf32>, vector<16x128xf32> -> vector<16x128xf32>
    %c0_3 = arith.constant 0 : index
    %c0_4 = arith.constant 0 : index
    %3 = vector.load %arg3[%c0_3, %c0_4] : memref<16x1xf32, #tpu.memory_space<vmem>>, vector<16x1xf32>
    %4 = vector.broadcast %3 : vector<16x1xf32> to vector<16x128xf32>
    %5 = arith.addf %2, %4 : vector<16x128xf32>
    %6 = arith.mulf %5, %5 : vector<16x128xf32>
    %cst_5 = arith.constant dense<0.000000e+00> : vector<128xf32>
    %7 = vector.multi_reduction <add>, %6, %cst_5 [0] : vector<16x128xf32> to vector<128xf32>
    %8 = vector.shape_cast %7 : vector<128xf32> to vector<1x128xf32>
    %cst_6 = arith.constant 1.000000e-24 : f32
    %9 = vector.broadcast %cst_6 : f32 to vector<1x128xf32>
    %10 = arith.maximumf %8, %9 : vector<1x128xf32>
    %11 = math.rsqrt %10 : vector<1x128xf32>
    %12 = vector.broadcast %11 : vector<1x128xf32> to vector<16x128xf32>
    %13 = arith.mulf %5, %12 : vector<16x128xf32>
    %c0_7 = arith.constant 0 : index
    %c0_8 = arith.constant 0 : index
    %14 = vector.load %arg6[%c0_7, %c0_8] : memref<16x128xf32, #tpu.memory_space<vmem>>, vector<16x128xf32>
    tpu.vector_store %arg6[%c0_7, %c0_8], %13 {strides = array<i32>} : memref<16x128xf32, #tpu.memory_space<vmem>>, vector<16x128xf32>,
    %c0_9 = arith.constant 0 : index
    %c0_10 = arith.constant 0 : index
    %15 = vector.load %arg4[%c0_9, %c0_10] : memref<128x4xf32, #tpu.memory_space<vmem>>, vector<128x4xf32>
    %c0_11 = arith.constant 0 : index
    %c0_12 = arith.constant 0 : index
    %16 = vector.load %arg5[%c0_11, %c0_12] : memref<4x8xf32, #tpu.memory_space<vmem>>, vector<4x8xf32>
    %cst_13 = arith.constant dense<0.000000e+00> : vector<128x8xf32>
    %17 = tpu.matmul %15, %16, %cst_13 {dimension_numbers = #tpu.dot_dimension_numbers<[1], [0], [0], [1], [0, 0, 1, 1], [], []>} : vector<128x4xf32>, vector<4x8xf32>, vector<128x8xf32> -> vector<128x8xf32>
    %c0_14 = arith.constant 0 : index
    %c0_15 = arith.constant 0 : index
    %18 = vector.load %arg7[%c0_14, %c0_15] : memref<128x8xf32, #tpu.memory_space<vmem>>, vector<128x8xf32>
    tpu.vector_store %arg7[%c0_14, %c0_15], %17 {strides = array<i32>} : memref<128x8xf32, #tpu.memory_space<vmem>>, vector<128x8xf32>,
    return
  }
  func.func @transform_0(%arg0: i32) -> (i32, i32) {
    %c0_i32 = arith.constant 0 : i32
    %c0_i32_0 = arith.constant 0 : i32
    return %arg0, %c0_i32 : i32, i32
  }
  func.func @transform_1(%arg0: i32) -> (i32, i32) {
    %c0_i32 = arith.constant 0 : i32
    %c0_i32_0 = arith.constant 0 : i32
    %c0_i32_1 = arith.constant 0 : i32
    return %c0_i32, %c0_i32_0 : i32, i32
  }
  func.func @transform_2(%arg0: i32) -> (i32, i32) {
    %c0_i32 = arith.constant 0 : i32
    %c0_i32_0 = arith.constant 0 : i32
    %c0_i32_1 = arith.constant 0 : i32
    return %c0_i32, %c0_i32_0 : i32, i32
  }
  func.func @transform_3(%arg0: i32) -> (i32, i32) {
    %c0_i32 = arith.constant 0 : i32
    %c0_i32_0 = arith.constant 0 : i32
    return %arg0, %c0_i32 : i32, i32
  }
  func.func @transform_4(%arg0: i32) -> (i32, i32) {
    %c0_i32 = arith.constant 0 : i32
    %c0_i32_0 = arith.constant 0 : i32
    %c0_i32_1 = arith.constant 0 : i32
    return %c0_i32, %c0_i32_0 : i32, i32
  }
  func.func @transform_5(%arg0: i32) -> (i32, i32) {
    %c0_i32 = arith.constant 0 : i32
    %c0_i32_0 = arith.constant 0 : i32
    return %c0_i32, %arg0 : i32, i32
  }
  func.func @transform_6(%arg0: i32) -> (i32, i32) {
    %c0_i32 = arith.constant 0 : i32
    %c0_i32_0 = arith.constant 0 : i32
    return %arg0, %c0_i32 : i32, i32
  }
}

</mosaic_0001>

<bundles_post_ra>
// kernel: tpu_custom_call.1
= control target key start
LH: loop header
LB: loop body
LE: loop exit
PB: predicated region body
PF: predicated region fallthrough
CT: control target
= control target key end

     0   :  { %vm87_vm0 = vcmask 261120   ;;  %s723_s0 = inlined_call_operand.vmem [shape: f32[128,32], index: 0, kind: input, shape index: {}]   ;;  %s724_s1 = inlined_call_operand.vmem [shape: f32[32,16], index: 1, kind: input, shape index: {}]   ;;  %s725_s2 = inlined_call_operand.vmem [shape: f32[16,1], index: 2, kind: input, shape index: {}]   ;;  %s726_s3 = inlined_call_operand.vmem [shape: f32[128,4], index: 3, kind: input, shape index: {}]   ;;  %s727_s4 = inlined_call_operand.vmem [shape: f32[4,8], index: 4, kind: input, shape index: {}]   ;;  %s728_s5 = inlined_call_operand.hbm [shape: f32[16,128], index: 5, kind: output, shape index: {0}]   ;;  %s729_s6 = inlined_call_operand.vmem [shape: f32[128,8], index: 6, kind: output, shape index: {1}]  }
   0x1   :  { %v23_v0 = vld [vmem:[%s724_s1] sm:$0xff]  ;;  %v42_v1 = vld [vmem:[%s723_s0 + $0x78] sm:$0xff]  ;;  %v41_v2 = vld [vmem:[%s723_s0 + $0x70] sm:$0xff] }
   0x2   :  { %55 = vxpose.xlu0.b32.start [1/4] (short) (narrow) %v23_v0, 16  ;;  %363 = vmatpush.xpose.msk.msra.mxu0 %vm87_vm0, %v42_v1 }
   0x3   :  { %398 = vmatpush.xpose.msk.msra.mxu3 %vm87_vm0, %v42_v1 }
   0x4   :  { %12 = vsyncpa [#allocation3], 0  ;;  %v24_v3 = vld [vmem:[%s724_s1 + $0x8] sm:$0xff]  ;;  %v39_v5 = vld [vmem:[%s723_s0 + $0x60] sm:$0xff]  ;;  %vm255_vm1 = vcmask 1043456   ;;  %vm206_vm2 = vcmask 31744  }
   0x5   :  { %v40_v4 = vld [vmem:[%s723_s0 + $0x68] sm:$0xff]  ;;  %v25_v6 = vld [vmem:[%s724_s1 + $0x10] sm:$0xff]  ;;  %v205_v7 = vld [vmem:[%s727_s4] sm:$0xf]  ;;  %v450_v25 = vmov 0   ;;  %vm324_vm3 = vcmask 64512  }
   0x6   :  { %364 = vmatpush.xpose.msk.msra.mxu0 %vm87_vm0, %v41_v2  ;;  %v38_v8 = vld [vmem:[%s723_s0 + $0x58] sm:$0xff]  ;;  %414 = vmatpush.msk.msra.mxu2 %vm255_vm1, %v205_v7  ;;  %v37_v10 = vld [vmem:[%s723_s0 + $0x50] sm:$0xff]  ;;  %v36_v12 = vld [vmem:[%s723_s0 + $0x48] sm:$0xff]  ;;  %s451_s22 = smov [#allocation2]  }
   0x7   :  { %399 = vmatpush.xpose.msk.msra.mxu3 %vm87_vm0, %v41_v2  ;;  %381 = vmatpush.msk.msra.mxu1 %vm255_vm1, %v205_v7  ;;  %v196_v9 = vld [vmem:[%s726_s3 + $0x38] sm:$0xff]  ;;  %v197_v13 = vld [vmem:[%s726_s3 + $0x40] sm:$0xff]  ;;  %v33_v16 = vld [vmem:[%s723_s0 + $0x30] sm:$0xff]  ;;  %s345_s23 = sshll.u32 %s451_s22, 4  ;;  %s346_s23 = int_to_ptr.vmem [resolvable:$true] %s345_s23 }
   0x8   :  { %389 = vmatmul.msk.f32.vlgmr.msra.gmra.mxu2 %vm206_vm2, %v196_v9  ;;  %v26_v11 = vld [vmem:[%s724_s1 + $0x18] sm:$0xff]  ;;  %v35_v14 = vld [vmem:[%s723_s0 + $0x40] sm:$0xff]  ;;  %v32_v17 = vld [vmem:[%s723_s0 + $0x28] sm:$0xff]  ;;  %420 = vset.pattern.permute.xlu1 %v450_v25  ;;  %s453_s1 = smov 8  }
   0x9   :  { %v34_v15 = vld [vmem:[%s723_s0 + $0x38] sm:$0xff]  ;;  %v31_v18 = vld [vmem:[%s723_s0 + $0x20] sm:$0xff]  ;;  %v29_v20 = vld [vmem:[%s723_s0 + $0x10] sm:$0xff] }
   0xa   :  { %56 = vxpose.xlu0.b32.cont [2/4] (short) (narrow) %v24_v3, 16  ;;  %365 = vmatpush.xpose.msk.msra.mxu0 %vm87_vm0, %v40_v4  ;;  %v30_v19 = vld [vmem:[%s723_s0 + $0x18] sm:$0xff]  ;;  %v28_v21 = vld [vmem:[%s723_s0 + $0x8] sm:$0xff]  ;;  %v27_v22 = vld [vmem:[%s723_s0] sm:$0xff] }
   0xb   :  { %400 = vmatpush.xpose.msk.msra.mxu3 %vm87_vm0, %v40_v4  ;;  %v198_v23 = vld [vmem:[%s726_s3 + $0x48] sm:$0xff]  ;;  %v189_v24 = vld [vmem:[%s726_s3] sm:$0xff]  ;;  %v199_v26 = vld [vmem:[%s726_s3 + $0x50] sm:$0xff] }
   0xc   :  { %382 = vmatmul.msk.f32.vlgmr.msra.gmra.mxu1 %vm206_vm2, %v189_v24  ;;  %v43_v27 = vld [vmem:[%s725_s2] sm:$0xff]  ;;  %v190_v28 = vld [vmem:[%s726_s3 + $0x8] sm:$0xff]  ;;  %v200_v29 = vld [vmem:[%s726_s3 + $0x58] sm:$0xff] }
   0xd   :  { %47 = vperm.xlu1 %420, %v43_v27   ;;  %v44_v30 = vld [vmem:[%s725_s2 + $0x8] sm:$0xff]  ;;  %v191_v31 = vld [vmem:[%s726_s3 + $0x10] sm:$0xff]  ;;  %v201_v33 = vld [vmem:[%s726_s3 + $0x60] sm:$0xff] }
   0xe   :  { %366 = vmatpush.xpose.msk.msra.mxu0 %vm87_vm0, %v39_v5  ;;  %v192_v34 = vld [vmem:[%s726_s3 + $0x18] sm:$0xff]  ;;  %v202_v35 = vld [vmem:[%s726_s3 + $0x68] sm:$0xff]  ;;  %v193_v37 = vld [vmem:[%s726_s3 + $0x20] sm:$0xff] }
   0xf   :  { %401 = vmatpush.xpose.msk.msra.mxu3 %vm87_vm0, %v39_v5  ;;  %v203_v38 = vld [vmem:[%s726_s3 + $0x70] sm:$0xff]  ;;  %v194_v40 = vld [vmem:[%s726_s3 + $0x28] sm:$0xff]  ;;  %v204_v41 = vld [vmem:[%s726_s3 + $0x78] sm:$0xff] }
  0x10   :  { %390 = vmatmul.msk.f32.gmra.mxu2 %vm206_vm2, %v197_v13  ;;  %v195_v42 = vld [vmem:[%s726_s3 + $0x30] sm:$0xff]  ;;  %s347_s3 = sshll.u32 %s728_s5, 4  ;;  %s348_s3 = int_to_ptr.hbm [resolvable:$true] %s347_s3 }
  0x12   :  { %57 = vxpose.xlu0.b32.cont [3/4] (short) (narrow) %v25_v6, 16  ;;  %367 = vmatpush.xpose.msk.msra.mxu0 %vm87_vm0, %v38_v8 }
  0x13   :  { %402 = vmatpush.xpose.msk.msra.mxu3 %vm87_vm0, %v38_v8 }
  0x14   :  { %383 = vmatmul.msk.f32.gmra.mxu1 %vm206_vm2, %v190_v28 }
  0x15   :  { %52 = vperm.xlu1 %420, %v44_v30  }
  0x16   :  { %368 = vmatpush.xpose.msk.msra.mxu0 %vm87_vm0, %v37_v10 }
  0x17   :  { %403 = vmatpush.xpose.msk.msra.mxu3 %vm87_vm0, %v37_v10 }
  0x18   :  { %391 = vmatmul.msk.f32.gmra.mxu2 %vm206_vm2, %v198_v23 }
  0x1a   :  { %58 = vxpose.xlu0.b32.end [4/4] (short) (narrow) %v26_v11, 16  ;;  %369 = vmatpush.xpose.msk.msra.mxu0 %vm87_vm0, %v36_v12 }
  0x1b   :  { %404 = vmatpush.xpose.msk.msra.mxu3 %vm87_vm0, %v36_v12 }
  0x1c   :  { %384 = vmatmul.msk.f32.gmra.mxu1 %vm206_vm2, %v191_v31 }
  0x1e   :  { %370 = vmatpush.xpose.msk.msra.mxu0 %vm87_vm0, %v35_v14 }
  0x1f   :  { %405 = vmatpush.xpose.msk.msra.mxu3 %vm87_vm0, %v35_v14 }
  0x20   :  { %392 = vmatmul.msk.f32.gmra.mxu2 %vm206_vm2, %v199_v26 }
  0x22   :  { %371 = vmatpush.xpose.msk.msra.mxu0 %vm87_vm0, %v34_v15 }
  0x23   :  { %406 = vmatpush.xpose.msk.msra.mxu3 %vm87_vm0, %v34_v15 }
  0x24   :  { %385 = vmatmul.msk.f32.gmra.mxu1 %vm206_vm2, %v192_v34 }
  0x26   :  { %372 = vmatpush.xpose.msk.msra.mxu0 %vm87_vm0, %v33_v16 }
  0x27   :  { %407 = vmatpush.xpose.msk.msra.mxu3 %vm87_vm0, %v33_v16 }
  0x28   :  { %393 = vmatmul.msk.f32.gmra.mxu2 %vm206_vm2, %v200_v29 }
  0x2a   :  { %373 = vmatpush.xpose.msk.msra.mxu0 %vm87_vm0, %v32_v17 }
  0x2b   :  { %408 = vmatpush.xpose.msk.msra.mxu3 %vm87_vm0, %v32_v17 }
  0x2c   :  { %386 = vmatmul.msk.f32.gmra.mxu1 %vm206_vm2, %v193_v37 }
  0x2e   :  { %374 = vmatpush.xpose.msk.msra.mxu0 %vm87_vm0, %v31_v18 }
  0x2f   :  { %409 = vmatpush.xpose.msk.msra.mxu3 %vm87_vm0, %v31_v18 }
  0x30   :  { %394 = vmatmul.msk.f32.gmra.mxu2 %vm206_vm2, %v201_v33 }
  0x32   :  { %375 = vmatpush.xpose.msk.msra.mxu0 %vm87_vm0, %v30_v19 }
  0x33   :  { %410 = vmatpush.xpose.msk.msra.mxu3 %vm87_vm0, %v30_v19 }
  0x34   :  { %387 = vmatmul.msk.f32.gmra.mxu1 %vm206_vm2, %v194_v40 }
  0x36   :  { %376 = vmatpush.xpose.msk.msra.mxu0 %vm87_vm0, %v29_v20 }
  0x37   :  { %411 = vmatpush.xpose.msk.msra.mxu3 %vm87_vm0, %v29_v20 }
  0x38   :  { %395 = vmatmul.msk.f32.gmra.mxu2 %vm206_vm2, %v202_v35 }
  0x3a   :  { %377 = vmatpush.xpose.msk.msra.mxu0 %vm87_vm0, %v28_v21 }
  0x3b   :  { %412 = vmatpush.xpose.msk.msra.mxu3 %vm87_vm0, %v28_v21 }
  0x3c   :  { %388 = vmatmul.msk.f32.gmra.mxu1 %vm206_vm2, %v195_v42 }
  0x3e   :  { %378 = vmatpush.xpose.msk.msra.mxu0 %vm87_vm0, %v27_v22 }
  0x3f   :  { %413 = vmatpush.xpose.msk.msra.mxu3 %vm87_vm0, %v27_v22 }
  0x40   :  { %396 = vmatmul.msk.f32.gmra.mxu2 %vm206_vm2, %v203_v38 }
  0x48   :  { %397 = vmatmul.msk.f32.gmra.mxu2 %vm206_vm2, %v204_v41 }
  0x7f   :  { %v48_v52 = vpop.permute.xlu1 %47 }
  0x81   :  { %421 = vset.pattern.permute.xlu0 %v450_v25 }
  0x87   :  { %v53_v57 = vpop.permute.xlu1 %52 }
  0x89   :  { %v276_v44 = vpop.f32.mrf.mxu1 }
  0x8a   :  { %325 = vst.msk [vmem:[%s729_s6] sm:$0xff] %vm324_vm3, %v276_v44 }
  0x8b   :  { %v297_v32 = vpop.f32.mrf.mxu2 }
  0x8c   :  { %332 = vst.msk [vmem:[%s729_s6 + $0x38] sm:$0xff] %vm324_vm3, %v297_v32 }
  0x91   :  { %v279_v46 = vpop.f32.mrf.mxu1 }
  0x92   :  { %326 = vst.msk [vmem:[%s729_s6 + $0x8] sm:$0xff] %vm324_vm3, %v279_v46 }
  0x93   :  { %v300_v43 = vpop.f32.mrf.mxu2 }
  0x94   :  { %333 = vst.msk [vmem:[%s729_s6 + $0x40] sm:$0xff] %vm324_vm3, %v300_v43 }
  0x99   :  { %v282_v48 = vpop.f32.mrf.mxu1 }
  0x9a   :  { %327 = vst.msk [vmem:[%s729_s6 + $0x10] sm:$0xff] %vm324_vm3, %v282_v48 }
  0x9b   :  { %v303_v45 = vpop.f32.mrf.mxu2 }
  0x9c   :  { %334 = vst.msk [vmem:[%s729_s6 + $0x48] sm:$0xff] %vm324_vm3, %v303_v45 }
  0xa1   :  { %v285_v50 = vpop.f32.mrf.mxu1 }
  0xa2   :  { %328 = vst.msk [vmem:[%s729_s6 + $0x18] sm:$0xff] %vm324_vm3, %v285_v50 }
  0xa3   :  { %v306_v47 = vpop.f32.mrf.mxu2 }
  0xa4   :  { %335 = vst.msk [vmem:[%s729_s6 + $0x50] sm:$0xff] %vm324_vm3, %v306_v47 }
  0xa6   :  { %v71_v36 = vpop.trf.xlu0 }
  0xa7   :  { %379 = vmatmul.msk.f32.vlgmr.msra.gmra.mxu0 %vm87_vm0, %v71_v36 }
  0xa9   :  { %v288_v53 = vpop.f32.mrf.mxu1 }
  0xaa   :  { %329 = vst.msk [vmem:[%s729_s6 + $0x20] sm:$0xff] %vm324_vm3, %v288_v53 }
  0xab   :  { %v309_v49 = vpop.f32.mrf.mxu2 }
  0xac   :  { %336 = vst.msk [vmem:[%s729_s6 + $0x58] sm:$0xff] %vm324_vm3, %v309_v49 }
  0xae   :  { %v72_v39 = vpop.trf.xlu0 }
  0xaf   :  { %380 = vmatmul.msk.f32.vlgmr.msra.gmra.mxu3 %vm87_vm0, %v72_v39 }
  0xb1   :  { %v291_v60 = vpop.f32.mrf.mxu1 }
  0xb2   :  { %330 = vst.msk [vmem:[%s729_s6 + $0x28] sm:$0xff] %vm324_vm3, %v291_v60 }
  0xb3   :  { %v312_v51 = vpop.f32.mrf.mxu2 }
  0xb4   :  { %337 = vst.msk [vmem:[%s729_s6 + $0x60] sm:$0xff] %vm324_vm3, %v312_v51 }
  0xb9   :  { %v294_v3 = vpop.f32.mrf.mxu1 }
  0xba   :  { %331 = vst.msk [vmem:[%s729_s6 + $0x30] sm:$0xff] %vm324_vm3, %v294_v3 }
  0xbb   :  { %v315_v54 = vpop.f32.mrf.mxu2 }
  0xbc   :  { %338 = vst.msk [vmem:[%s729_s6 + $0x68] sm:$0xff] %vm324_vm3, %v315_v54 }
  0xc3   :  { %v318_v63 = vpop.f32.mrf.mxu2 }
  0xc4   :  { %339 = vst.msk [vmem:[%s729_s6 + $0x70] sm:$0xff] %vm324_vm3, %v318_v63 }
  0xcb   :  { %v321_v5 = vpop.f32.mrf.mxu2 }
  0xcc   :  { %340 = vst.msk [vmem:[%s729_s6 + $0x78] sm:$0xff] %vm324_vm3, %v321_v5  ;;  %s452_s6 = smov 128  }
 0x124   :  { %v159_v55 = vpop.f32.mrf.mxu0 }
 0x125   :  { %v160_v56 = vadd.f32 %v159_v55, %v48_v52 }
 0x127   :  { %v165_v61 = vmul.f32 %v160_v56, %v160_v56 }
 0x132   :  { %v162_v58 = vpop.f32.mrf.mxu3 }
 0x133   :  { %v163_v59 = vadd.f32 %v162_v58, %v53_v57 }
 0x135   :  { %v166_v62 = vmul.f32 %v163_v59, %v163_v59 }
 0x137   :  { %v167_v0 = vadd.f32 %v166_v62, %v165_v61 }
 0x139   :  { %v168_v1 = vrot.slane %v167_v0, 4 }
 0x13b   :  { %v169_v2 = vadd.f32 %v168_v1, %v167_v0 }
 0x13d   :  { %v170_v4 = vrot.slane %v169_v2, 2 }
 0x13f   :  { %v171_v6 = vadd.f32 %v170_v4, %v169_v2 }
 0x141   :  { %v172_v7 = vrot.slane %v171_v6, 1 }
 0x143   :  { %v173_v8 = vadd.f32 %v172_v7, %v171_v6 }
 0x145   :  { %v174_v9 = vmax.f32 %v173_v8, 1e-24 }
 0x147   :  { %422 = vrsqrt.f32 %v174_v9  ;;  %vm181_vm5 = vweird.f32 %v174_v9 }
 0x14d   :  { %v423_v10 = vpop.eup %422 }
 0x14e   :  { %v176_v11 = vmul.f32 %v423_v10, %v174_v9  ;;  %vm182_vm4 = vweird.f32 %v423_v10 }
 0x14f   :  { %vm183_vm6 = vmor %vm181_vm5, %vm182_vm4 }
 0x150   :  { %v177_v12 = vmul.f32 %v423_v10, %v176_v11 }
 0x152   :  { %v178_v13 = vmul.f32 0.5, %v177_v12 }
 0x154   :  { %v179_v14 = vsub.f32 1.5, %v178_v13 }
 0x156   :  { %v180_v15 = vmul.f32 %v423_v10, %v179_v14 }
 0x158   :  { %v184_v16 = vsel %vm183_vm6, %v423_v10, %v180_v15 }
 0x159   :  { %v185_v17 = vmul.f32 %v184_v16, %v160_v56  ;;  %v186_v18 = vmul.f32 %v184_v16, %v163_v59 }
 0x15b   :  { %187 = vst [vmem:[#allocation2] sm:$0xff] %v185_v17 }
 0x15c   :  { %188 = vst [vmem:[#allocation2 + $0x8] sm:$0xff] %v186_v18 }
 0x15d   :  { %353 = dma.vmem_to_hbm [thread:$0]  %s346_s23, 256, %s348_s3, [#allocation3], %s452_s6, %s452_s6, %s453_s1  }
 0x15e   :  { %448 = dma.done.wait [#allocation3], 256  }
 0x15f   :  { %449 = vsyncadd [#allocation3], 4294967040 }
 0x160   :  { %362 = vsyncpa [#allocation3], 1 }

</bundles_post_ra>
